<compile_context>
chip_gen: v7x
topology: tpu7x:2x2x1
jax: 0.10.0
libtpu: 0.0.40
codegen_flags: <defaults>
</compile_context>

<pallas_src>
import functools

import jax
import jax.numpy as jnp
from jax.experimental import pallas as pl
from jax.experimental.pallas import tpu as pltpu


def _classifier_kernel(x_ref, w1_ref, b1_ref, w2_ref, b2_ref, out_ref,
                       acc_ref, *, hw_true, hw_tile, mask_tail):
    """x_ref : (b_tile, C, hw_tile)   -- native NCHW, HW on lanes
       w1_ref: (C, hidden)   b1_ref: (1, hidden)
       w2_ref: (hidden, NC)  b2_ref: (1, NC)
       out_ref: (b_tile, 1, NC)
       acc_ref: (b_tile, C) f32 scratch, persists across the HW grid axis."""
    k = pl.program_id(1)

    @pl.when(k == 0)
    def _():
        acc_ref[...] = jnp.zeros_like(acc_ref)

    x_blk = x_ref[...]
    if mask_tail:
        # Only the ragged last spatial tile has out-of-bounds (unspecified)
        # lanes; zero them before folding into the sum.
        hw_idx = jax.lax.broadcasted_iota(jnp.int32, x_blk.shape, 2)
        valid = hw_idx < (hw_true - k * hw_tile)
        x_blk = jnp.where(valid, x_blk, jnp.zeros_like(x_blk))

    # Streaming partial sum over lanes (XLU); f32 accumulation.
    acc_ref[...] += jnp.sum(x_blk, axis=-1, dtype=jnp.float32)

    @pl.when(k == pl.num_programs(1) - 1)
    def _():
        pooled = acc_ref[...] * jnp.float32(1.0 / hw_true)      # (b_tile, C)
        # fc1 + ReLU: MXU in the weights' native dtype, f32 accumulate.
        h = jnp.dot(pooled.astype(w1_ref.dtype), w1_ref[...],
                    preferred_element_type=jnp.float32)
        h = jnp.maximum(h + b1_ref[...].astype(jnp.float32), 0.0)
        # fc2
        out = jnp.dot(h.astype(w2_ref.dtype), w2_ref[...],
                      preferred_element_type=jnp.float32)
        out = out + b2_ref[...].astype(jnp.float32)
        out_ref[...] = out.astype(out_ref.dtype)[:, None, :]


def _pick_b_tile(b):
    """Keep the parallel batch axis >= 2 grid steps when B >= 2 (v7x has two
    TensorCores); cap at 8 for larger batches (kernel is mem-bound anyway)."""
    if b >= 16:
        return 8
    if b >= 2:
        return max(1, b // 2)
    return 1


def _pick_hw_tile(b_tile, c, hw, budget_f32_bytes):
    """Largest lane-aligned (multiple-of-128) spatial tile whose block stays
    under `budget_f32_bytes` counted at 4 B/elem (so even a worst-case f32
    materialization of a low-precision block fits in VMEM)."""
    per_elem = max(1, b_tile * c) * 4
    max_tile = max(1, budget_f32_bytes // per_elem)
    if hw <= max_tile:
        return hw                       # whole spatial extent in one block
    return max(128, (max_tile // 128) * 128)


def hsimsi_classifier_forward(x_nchw, w1, b1, w2, b2, *,
                              hw_block_budget_bytes=16 * 1024 * 1024):
    """x_nchw: (B, C, H, W) with C = 2*hidden.
       w1: (hidden, 2*hidden), b1: (hidden,), w2: (num_classes, hidden),
       b2: (num_classes,)  -- PyTorch nn.Linear layout."""
    B, C, H, W = x_nchw.shape
    hidden = w1.shape[0]
    num_classes = w2.shape[0]
    HW = H * W

    # Free row-major reshape (no transpose, no pad): x streamed exactly once.
    x = x_nchw.reshape(B, C, HW)

    b_tile = _pick_b_tile(B)
    hw_tile = _pick_hw_tile(b_tile, C, HW, hw_block_budget_bytes)
    b_steps = pl.cdiv(B, b_tile)
    hw_steps = pl.cdiv(HW, hw_tile)
    mask_tail = (HW % hw_tile) != 0

    # Pre-transpose weights to (in, out) so the kernel does plain x @ W + b.
    w1_t = w1.T                              # (C, hidden)
    w2_t = w2.T                              # (hidden, num_classes)
    b1_2d = b1.reshape(1, hidden)
    b2_2d = b2.reshape(1, num_classes)

    kernel = functools.partial(_classifier_kernel, hw_true=HW,
                               hw_tile=hw_tile, mask_tail=mask_tail)

    itemsize = jnp.dtype(x.dtype).itemsize
    flops = (B * C * HW                       # pooling adds
             + 2 * B * C * hidden             # fc1
             + 2 * B * hidden * num_classes)  # fc2
    bytes_accessed = (x.size * itemsize
                      + w1_t.size * jnp.dtype(w1_t.dtype).itemsize
                      + w2_t.size * jnp.dtype(w2_t.dtype).itemsize
                      + b1_2d.size * jnp.dtype(b1_2d.dtype).itemsize
                      + b2_2d.size * jnp.dtype(b2_2d.dtype).itemsize
                      + B * num_classes * itemsize)

    out3 = pl.pallas_call(
        kernel,
        out_shape=jax.ShapeDtypeStruct((B, 1, num_classes), x_nchw.dtype),
        grid_spec=pltpu.PrefetchScalarGridSpec(
            num_scalar_prefetch=0,
            grid=(b_steps, hw_steps),
            in_specs=[
                # Streamed input: tile over (batch, spatial); full C on
                # sublanes, HW on lanes.
                pl.BlockSpec((b_tile, C, hw_tile), lambda b, k: (b, 0, k)),
                # Resident weights/biases: constant block index -> no re-DMA.
                pl.BlockSpec((C, hidden), lambda b, k: (0, 0)),
                pl.BlockSpec((1, hidden), lambda b, k: (0, 0)),
                pl.BlockSpec((hidden, num_classes), lambda b, k: (0, 0)),
                pl.BlockSpec((1, num_classes), lambda b, k: (0, 0)),
            ],
            out_specs=pl.BlockSpec((b_tile, 1, num_classes),
                                   lambda b, k: (b, 0, 0)),
            scratch_shapes=[pltpu.VMEM((b_tile, C), jnp.float32)],
        ),
        compiler_params=pltpu.CompilerParams(
            dimension_semantics=("parallel", "arbitrary"),
            vmem_limit_bytes=48 * 1024 * 1024,
        ),
        cost_estimate=pl.CostEstimate(flops=flops, transcendentals=0,
                                      bytes_accessed=bytes_accessed),
    )(x, w1_t, b1_2d, w2_t, b2_2d)

    return out3.reshape(B, num_classes)


def _reference(x_nchw, w1, b1, w2, b2):
    pooled = jnp.mean(x_nchw.astype(jnp.float32), axis=(2, 3))
    h = jnp.maximum(pooled @ w1.T.astype(jnp.float32) + b1, 0.0)
    return h @ w2.T.astype(jnp.float32) + b2


if __name__ == "__main__":
    # Shapes implied by the module: C = hidden_size * 2.
    hidden_size = 32
    num_classes = 8
    B, C, H, W = 2, hidden_size * 2, 8, 8

    key = jax.random.PRNGKey(0)
    kx, k1, k2, k3, k4 = jax.random.split(key, 5)

    x = jax.random.normal(kx, (B, C, H, W), dtype=jnp.float32)
    # Deterministic synthetic parameters (PyTorch Linear layout: (out, in)).
    w1 = jax.random.normal(k1, (hidden_size, hidden_size * 2), jnp.float32) * 0.05
    b1 = jax.random.normal(k2, (hidden_size,), jnp.float32) * 0.05
    w2 = jax.random.normal(k3, (num_classes, hidden_size), jnp.float32) * 0.05
    b2 = jax.random.normal(k4, (num_classes,), jnp.float32) * 0.05

    fwd = jax.jit(hsimsi_classifier_forward,
                  static_argnames=("hw_block_budget_bytes",))

    # Case 1: single spatial block (HW fits in one tile).
    out = jax.block_until_ready(fwd(x, w1, b1, w2, b2))
    ref = _reference(x, w1, b1, w2, b2)
    assert out.shape == (B, num_classes)
    assert jnp.allclose(out, ref, atol=1e-4, rtol=1e-4), (
        f"max err {jnp.max(jnp.abs(out - ref))}")

    # Case 2: multi-tile spatial streaming with a ragged (masked) tail tile,
    # forced with a tiny artificial block budget (hw_tile=128 over HW=200).
    H2, W2 = 10, 20
    x2 = jax.random.normal(kx, (B, C, H2, W2), dtype=jnp.float32)
    out2 = jax.block_until_ready(
        fwd(x2, w1, b1, w2, b2, hw_block_budget_bytes=32 * 1024))
    ref2 = _reference(x2, w1, b1, w2, b2)
    assert jnp.allclose(out2, ref2, atol=1e-4, rtol=1e-4), (
        f"max err {jnp.max(jnp.abs(out2 - ref2))}")

    print("KERNEL_OK")
</pallas_src>

<mosaic_0001>
module attributes {stable_mosaic.version = 11 : i64} {
  func.func @_classifier_kernel(%arg0: i32, %arg1: i32, %arg2: memref<1x64x64xf32, #tpu.memory_space<vmem>>, %arg3: memref<64x32xf32, #tpu.memory_space<vmem>>, %arg4: memref<1x32xf32, #tpu.memory_space<vmem>>, %arg5: memref<32x8xf32, #tpu.memory_space<vmem>>, %arg6: memref<1x8xf32, #tpu.memory_space<vmem>>, %arg7: memref<1x1x8xf32, #tpu.memory_space<vmem>>, %arg8: memref<1x64xf32, #tpu.memory_space<vmem>>) attributes {dimension_semantics = [#tpu.dimension_semantics<parallel>, #tpu.dimension_semantics<arbitrary>], iteration_bounds = array<i64: 2, 1>, scalar_prefetch = 0 : i64, scratch_operands = 1 : i64, tpu.core_type = #tpu.core_type<tc>, window_params = [{transform_indices = @transform_0, window_bounds = array<i64: 1, 64, 64>}, {pipeline_mode = #tpu.pipeline_mode<synchronous>, transform_indices = @transform_1, window_bounds = array<i64: 64, 32>}, {pipeline_mode = #tpu.pipeline_mode<synchronous>, transform_indices = @transform_2, window_bounds = array<i64: 1, 32>}, {pipeline_mode = #tpu.pipeline_mode<synchronous>, transform_indices = @transform_3, window_bounds = array<i64: 32, 8>}, {pipeline_mode = #tpu.pipeline_mode<synchronous>, transform_indices = @transform_4, window_bounds = array<i64: 1, 8>}, {transform_indices = @transform_5, window_bounds = array<i64: 1, 1, 8>}]} {
    %c0_i32 = arith.constant 0 : i32
    %0 = arith.cmpi eq, %arg1, %c0_i32 : i32
    %1 = arith.extui %0 : i1 to i32
    %c0_i32_0 = arith.constant 0 : i32
    %2 = arith.cmpi ne, %1, %c0_i32_0 : i32
    scf.if %2 {
      %cst_9 = arith.constant 0.000000e+00 : f32
      %11 = vector.broadcast %cst_9 : f32 to vector<1x64xf32>
      %c0_10 = arith.constant 0 : index
      %c0_11 = arith.constant 0 : index
      %12 = vector.load %arg8[%c0_10, %c0_11] : memref<1x64xf32, #tpu.memory_space<vmem>>, vector<1x64xf32>
      tpu.vector_store %arg8[%c0_10, %c0_11], %11 {strides = array<i32>} : memref<1x64xf32, #tpu.memory_space<vmem>>, vector<1x64xf32>,
    } else {
    }
    %c0 = arith.constant 0 : index
    %c0_1 = arith.constant 0 : index
    %c0_2 = arith.constant 0 : index
    %3 = vector.load %arg2[%c0, %c0_1, %c0_2] : memref<1x64x64xf32, #tpu.memory_space<vmem>>, vector<1x64x64xf32>
    %c0_3 = arith.constant 0 : index
    %c0_4 = arith.constant 0 : index
    %4 = vector.load %arg8[%c0_3, %c0_4] : memref<1x64xf32, #tpu.memory_space<vmem>>, vector<1x64xf32>
    %cst = arith.constant dense<0.000000e+00> : vector<1x64xf32>
    %5 = vector.multi_reduction <add>, %3, %cst [2] : vector<1x64x64xf32> to vector<1x64xf32>
    %6 = arith.addf %4, %5 : vector<1x64xf32>
    %c0_5 = arith.constant 0 : index
    %c0_6 = arith.constant 0 : index
    %7 = vector.load %arg8[%c0_5, %c0_6] : memref<1x64xf32, #tpu.memory_space<vmem>>, vector<1x64xf32>
    tpu.vector_store %arg8[%c0_5, %c0_6], %6 {strides = array<i32>} : memref<1x64xf32, #tpu.memory_space<vmem>>, vector<1x64xf32>,
    %c0_i32_7 = arith.constant 0 : i32
    %8 = arith.cmpi eq, %arg1, %c0_i32_7 : i32
    %9 = arith.extui %8 : i1 to i32
    %c0_i32_8 = arith.constant 0 : i32
    %10 = arith.cmpi ne, %9, %c0_i32_8 : i32
    scf.if %10 {
      %c0_9 = arith.constant 0 : index
      %c0_10 = arith.constant 0 : index
      %11 = vector.load %arg8[%c0_9, %c0_10] : memref<1x64xf32, #tpu.memory_space<vmem>>, vector<1x64xf32>
      %cst_11 = arith.constant 1.562500e-02 : f32
      %12 = vector.broadcast %cst_11 : f32 to vector<1x64xf32>
      %13 = arith.mulf %11, %12 : vector<1x64xf32>
      %c0_12 = arith.constant 0 : index
      %c0_13 = arith.constant 0 : index
      %14 = vector.load %arg3[%c0_12, %c0_13] : memref<64x32xf32, #tpu.memory_space<vmem>>, vector<64x32xf32>
      %cst_14 = arith.constant dense<0.000000e+00> : vector<1x32xf32>
      %15 = tpu.matmul %13, %14, %cst_14 {dimension_numbers = #tpu.dot_dimension_numbers<[1], [0], [0], [1], [0, 0, 1, 1], [], []>} : vector<1x64xf32>, vector<64x32xf32>, vector<1x32xf32> -> vector<1x32xf32>
      %c0_15 = arith.constant 0 : index
      %c0_16 = arith.constant 0 : index
      %16 = vector.load %arg4[%c0_15, %c0_16] : memref<1x32xf32, #tpu.memory_space<vmem>>, vector<1x32xf32>
      %17 = arith.addf %15, %16 : vector<1x32xf32>
      %cst_17 = arith.constant 0.000000e+00 : f32
      %18 = vector.broadcast %cst_17 : f32 to vector<1x32xf32>
      %19 = arith.maximumf %17, %18 : vector<1x32xf32>
      %c0_18 = arith.constant 0 : index
      %c0_19 = arith.constant 0 : index
      %20 = vector.load %arg5[%c0_18, %c0_19] : memref<32x8xf32, #tpu.memory_space<vmem>>, vector<32x8xf32>
      %cst_20 = arith.constant dense<0.000000e+00> : vector<1x8xf32>
      %21 = tpu.matmul %19, %20, %cst_20 {dimension_numbers = #tpu.dot_dimension_numbers<[1], [0], [0], [1], [0, 0, 1, 1], [], []>} : vector<1x32xf32>, vector<32x8xf32>, vector<1x8xf32> -> vector<1x8xf32>
      %c0_21 = arith.constant 0 : index
      %c0_22 = arith.constant 0 : index
      %22 = vector.load %arg6[%c0_21, %c0_22] : memref<1x8xf32, #tpu.memory_space<vmem>>, vector<1x8xf32>
      %23 = arith.addf %21, %22 : vector<1x8xf32>
      %24 = vector.shape_cast %23 : vector<1x8xf32> to vector<1x1x8xf32>
      %c0_23 = arith.constant 0 : index
      %c0_24 = arith.constant 0 : index
      %c0_25 = arith.constant 0 : index
      %25 = vector.load %arg7[%c0_23, %c0_24, %c0_25] : memref<1x1x8xf32, #tpu.memory_space<vmem>>, vector<1x1x8xf32>
      tpu.vector_store %arg7[%c0_23, %c0_24, %c0_25], %24 {strides = array<i32>} : memref<1x1x8xf32, #tpu.memory_space<vmem>>, vector<1x1x8xf32>,
    } else {
    }
    return
  }
  func.func @transform_0(%arg0: i32, %arg1: i32) -> (i32, i32, i32) {
    %c0_i32 = arith.constant 0 : i32
    %c0_i32_0 = arith.constant 0 : i32
    return %arg0, %c0_i32, %arg1 : i32, i32, i32
  }
  func.func @transform_1(%arg0: i32, %arg1: i32) -> (i32, i32) {
    %c0_i32 = arith.constant 0 : i32
    %c0_i32_0 = arith.constant 0 : i32
    %c0_i32_1 = arith.constant 0 : i32
    return %c0_i32, %c0_i32_0 : i32, i32
  }
  func.func @transform_2(%arg0: i32, %arg1: i32) -> (i32, i32) {
    %c0_i32 = arith.constant 0 : i32
    %c0_i32_0 = arith.constant 0 : i32
    %c0_i32_1 = arith.constant 0 : i32
    return %c0_i32, %c0_i32_0 : i32, i32
  }
  func.func @transform_3(%arg0: i32, %arg1: i32) -> (i32, i32) {
    %c0_i32 = arith.constant 0 : i32
    %c0_i32_0 = arith.constant 0 : i32
    %c0_i32_1 = arith.constant 0 : i32
    return %c0_i32, %c0_i32_0 : i32, i32
  }
  func.func @transform_4(%arg0: i32, %arg1: i32) -> (i32, i32) {
    %c0_i32 = arith.constant 0 : i32
    %c0_i32_0 = arith.constant 0 : i32
    %c0_i32_1 = arith.constant 0 : i32
    return %c0_i32, %c0_i32_0 : i32, i32
  }
  func.func @transform_5(%arg0: i32, %arg1: i32) -> (i32, i32, i32) {
    %c0_i32 = arith.constant 0 : i32
    %c0_i32_0 = arith.constant 0 : i32
    %c0_i32_1 = arith.constant 0 : i32
    return %arg0, %c0_i32, %c0_i32_0 : i32, i32, i32
  }
}

</mosaic_0001>

<bundles_post_ra>
// kernel: hsimsi_classifier_forward.1
= control target key start
LH: loop header
LB: loop body
LE: loop exit
PB: predicated region body
PF: predicated region fallthrough
CT: control target
= control target key end

     0   :  { %10 = vsyncpa [#allocation4], 0  ;;  %s1860_s0 = inlined_call_operand.vmem [shape: f32[2,64,64], index: 0, kind: input, shape index: {}]   ;;  %s1861_s1 = inlined_call_operand.vmem [shape: f32[64,32], index: 1, kind: input, shape index: {}]   ;;  %s1862_s2 = inlined_call_operand.vmem [shape: f32[1,32], index: 2, kind: input, shape index: {}]   ;;  %s1863_s3 = inlined_call_operand.vmem [shape: f32[32,8], index: 3, kind: input, shape index: {}]   ;;  %s1864_s4 = inlined_call_operand.vmem [shape: f32[1,8], index: 4, kind: input, shape index: {}]   ;;  %s1865_s5 = inlined_call_operand.hbm [shape: f32[2,1,8], index: 5, kind: output, shape index: {}]  }
   0x1   :  { %12 = vsyncpa [#allocation4 + $0x1], 0  ;;  %s1542_s18 = smov 0   ;;  %s1544_s19 = smov 0  }
   0x2   :  { %s1546_s20 = smov 0   ;;  %s1548_s21 = smov 0  }
   0x3   :  { %s1550_s22 = smov 0   ;;  %s1552_s23 = smov 0  }
   0x4 LB: > { %s1289_s24 = sadd.s32 4294967295, %s1504_s23   ;;  %s1290_s25 = sadd.s32 4294967294, %s1504_s23   ;;  %s1504_s23 = sphi %s1552_s23, %s18_s23   ;;  %s1500_s22 = sphi %s1550_s22, %s1872_s22   ;;  %s1496_s21 = sphi %s1548_s21, %s1871_s21   ;;  %s1492_s20 = sphi %s1546_s20, %s1870_s20   ;;  %s1488_s19 = sphi %s1544_s19, %s1869_s19   ;;  %s1484_s18 = sphi %s1542_s18, %s1868_s18  }
   0x5   : > { %s30_s26 = sadd.s32 1, %s1500_s22  ;;  %s149_s27 = sadd.s32 1, %s1492_s20 }
   0x6   : > { %p32_p0 = scmp.ge.s32.totalorder %s30_s26, 2  ;;  %p159_p1 = scmp.ne.s32.totalorder %s1492_s20, %s1488_s19 }
   0x7   : > { %p160_p2 = scmp.eq.s32.totalorder %s1289_s24, 1  ;;  %p165_p3 = scmp.ne.s32.totalorder %s1488_s19, %s1484_s18 }
   0x8   : > { %s1874_s26 = smov (%p32_p0, %s30_s26), 0  ;;  %p166_p5 = scmp.eq.s32.totalorder %s1290_s25, 1 }
   0x9   : > { %p1582_p4 = por %p160_p2, %p159_p1  ;;  %s146_s29 = ssub.s32 %s1500_s22, %s1874_s26 }
   0xa   : > { %p1293_p6 = scmp.ge.s32.totalorder %s1504_s23, 1  ;;  %p147_p7 = scmp.eq.s32.totalorder %s146_s29, 0 }
   0xb   : > { %p1589_p8 = por %p166_p5, %p165_p3  ;;  %p207_p9 = scmp.lt.s32.totalorder %s1504_s23, 3 }
   0xc   : > { %s1595_s6 = scalar_select %p147_p7, %s1492_s20, %s149_s27  }
   0xd   : > { %p208_p10 = pnand %p1293_p6, %p207_p9 }
   0xe   : > { %p237_p11 = scmp.lt.s32.totalorder (!%p208_p10), %s1496_s21, 1  ;;  %vm260_vm0 = vcmask (!%p208_p10), 523264   ;;  %v1506_v16 = vmov (!%p208_p10), 0   ;;  %v293_v17 = vlaneseq (!%p208_p10)  ;;  %v1507_v18 = vmov (!%p208_p10), 1966171168  }
   0xf   : > { %211 = sbr.rel (%p208_p10) target bundleno = 810 (0x32a), region = 40  ;;  %1424 = vset.pattern.permute.xlu0 (!%p208_p10), %v1506_v16  ;;  %1425 = vset.pattern.permute.xlu1 (!%p208_p10), %v1506_v16  ;;  %v554_v19 = vunpack.c.l.s4 (!%p208_p10), %v1507_v18  ;;  %vm249_vm1 = vcmask (!%p208_p10), 516096   ;;  %vm1510_vm2 = vmmov (!%p208_p10), 0   ;;  %vm976_vm3 = vcmask (!%p208_p10), 130112  }
  0x10   : > { %v1611_v20 = vshrl.u32 (!%p208_p10), %v293_v17, 7  ;;  %vm983_vm4 = vcmask (!%p208_p10), 195712   ;;  %vm990_vm5 = vcmask (!%p208_p10), 261312   ;;  %vm997_vm6 = vcmask (!%p208_p10), 326912  }
  0x11   : > { %v555_v21 = vunpack.c.0.s8 (!%p208_p10), %v554_v19  ;;  %vm1004_vm7 = vcmask (!%p208_p10), 392512   ;;  %vm1011_vm8 = vcmask (!%p208_p10), 458112   ;;  %vm1018_vm9 = vcmask (!%p208_p10), 523712  }
  0x12   : > { %v1614_v22 = vsub.s32 (!%p208_p10), 0, %v1611_v20  ;;  %v1617_v23 = vsub.s32 (!%p208_p10), 1, %v1611_v20  ;;  %v1620_v24 = vsub.s32 (!%p208_p10), 2, %v1611_v20  ;;  %v1623_v25 = vsub.s32 (!%p208_p10), 3, %v1611_v20 }
  0x13   : > { %v1626_v26 = vsub.s32 (!%p208_p10), 4, %v1611_v20  ;;  %v1629_v27 = vsub.s32 (!%p208_p10), 5, %v1611_v20  ;;  %v1632_v28 = vsub.s32 (!%p208_p10), 6, %v1611_v20  ;;  %v1635_v29 = vsub.s32 (!%p208_p10), 7, %v1611_v20 }
  0x14   : > { %v1638_v32 = vsub.s32 (!%p208_p10), %v555_v21, %v1611_v20  ;;  %vm1131_vm10 = vcmask (!%p208_p10), 261120   ;;  %vm1205_vm11 = vcmask (!%p208_p10), 57344  }
  0x16   : > { %s238_s7 = scalar_select %p237_p11, %s1496_s21, 1 }
  0x18   : > { %s1301_s8 = sshll.u32 %s238_s7, 6 }
  0x19   : > { %s244_s11 = scalar_lea.vmem %s1860_s0, %s1301_s8  ;;  %s235_s8 = sand.u32 1, %s1488_s19  }
  0x1a   : > { %v251_v0 = vld [vmem:[%s244_s11] sm:$0xff]  ;;  %v252_v1 = vld [vmem:[%s244_s11 + $0x8] sm:$0xff]  ;;  %v253_v2 = vld [vmem:[%s244_s11 + $0x10] sm:$0xff]  ;;  %s236_s12 = scalar_lea.vmem [#allocation3], %s235_s8  ;;  %s1208_s17 = scalar_lea.sflag [#allocation4], %s235_s8 }
  0x1b   : > { %v261_v3 = vsel %vm260_vm0, %v251_v0, 0.0  ;;  %v267_v4 = vsel %vm260_vm0, %v253_v2, 0.0  ;;  %v254_v5 = vld [vmem:[%s244_s11 + $0x18] sm:$0xff]  ;;  %v264_v6 = vsel %vm260_vm0, %v252_v1, 0.0  ;;  %v255_v8 = vld [vmem:[%s244_s11 + $0x20] sm:$0xff]  ;;  %v256_v9 = vld [vmem:[%s244_s11 + $0x28] sm:$0xff] }
  0x1c   : > { %262 = vadd.xlane.f32.xlu0 %v261_v3  ;;  %268 = vadd.xlane.f32.xlu1 %v267_v4  ;;  %v270_v7 = vsel %vm260_vm0, %v254_v5, 0.0  ;;  %v273_v10 = vsel %vm260_vm0, %v255_v8, 0.0  ;;  %v276_v11 = vsel %vm260_vm0, %v256_v9, 0.0  ;;  %v257_v12 = vld [vmem:[%s244_s11 + $0x30] sm:$0xff]  ;;  %v258_v13 = vld [vmem:[%s244_s11 + $0x38] sm:$0xff]  ;;  %s1298_s11 = sshll.u32 %s1496_s21, 4 }
  0x1d   : > { %v279_v14 = vsel %vm260_vm0, %v257_v12, 0.0  ;;  %v282_v15 = vsel %vm260_vm0, %v258_v13, 0.0  ;;  %s1220_s13 = sshll.u32 %s236_s12, 4  ;;  %s1813_s16 = scalar_lea.hbm %s1865_s5, %s1298_s11  ;;  %s1815_s13 = int_to_ptr.vmem [resolvable:$true] %s1220_s13 }
  0x1e   : > { %s1426_s24 = scalar_lea.vmem %s1815_s13, 16  ;;  %s1511_s21 = smov [#allocation3]  }
  0x1f   : > { %p1427_p12 = scmp.ne.s32.totalorder %s1815_s13, %s1426_s24  ;;  %s1430_s25 = sshll.u32 %s1511_s21, 4  ;;  %s1431_s25 = int_to_ptr.vmem [resolvable:$false] %s1430_s25 }
  0x20   : > { %265 = vadd.xlane.f32.xlu0 %v264_v6  ;;  %271 = vadd.xlane.f32.xlu1 %v270_v7  ;;  %s1432_s27 = scalar_lea.vmem %s1431_s25, 32  ;;  %p1433_p1 = scmp.lt.s32.totalorder %s1815_s13, %s1431_s25 }
  0x21   : > { %p1428_p13 = pnand %p1427_p12, %p1582_p4  ;;  %p1434_p2 = scmp.lt.s32.totalorder %s1432_s27, %s1426_s24 }
  0x23   : > { %p1429_p0 = pneg %p1428_p13  ;;  %p1435_p3 = por %p1434_p2, %p1433_p1 }
  0x24   : > { %274 = vadd.xlane.f32.xlu0 %v273_v10  ;;  %277 = vadd.xlane.f32.xlu1 %v276_v11 }
  0x25   : > { %p1436_p5 = pnand %p1435_p3, %p1429_p0 }
  0x28   : > { %280 = vadd.xlane.f32.xlu0 %v279_v14  ;;  %283 = vadd.xlane.f32.xlu1 %v282_v15 }
  0xa9   : > { %v263_v30 = vpop.xlane.xlu0 %262  ;;  %v269_v31 = vpop.xlane.xlu1 %268 }
  0xaa   : > { %v296_v33 = vrot.slane %v263_v30, %v1614_v22  ;;  %v300_v34 = vrot.slane %v263_v30, %v1617_v23  ;;  %v304_v35 = vrot.slane %v263_v30, %v1620_v24  ;;  %v308_v36 = vrot.slane %v263_v30, %v1623_v25 }
  0xab   : > { %v312_v37 = vrot.slane %v263_v30, %v1626_v26  ;;  %v316_v38 = vrot.slane %v263_v30, %v1629_v27  ;;  %v320_v39 = vrot.slane %v263_v30, %v1632_v28  ;;  %v324_v40 = vrot.slane %v263_v30, %v1635_v29 }
  0xac   : > { %v549_v41 = vcombine.low %v296_v33, %v300_v34  ;;  %v550_v42 = vcombine.low %v304_v35, %v308_v36  ;;  %v360_v43 = vrot.slane %v269_v31, %v1614_v22  ;;  %v364_v44 = vrot.slane %v269_v31, %v1617_v23 }
  0xad   : > { %v266_v45 = vpop.xlane.xlu0 %265  ;;  %v551_v46 = vcombine.low %v312_v37, %v316_v38  ;;  %v552_v47 = vcombine.low %v320_v39, %v324_v40  ;;  %v368_v48 = vrot.slane %v269_v31, %v1620_v24  ;;  %v372_v49 = vrot.slane %v269_v31, %v1623_v25  ;;  %v272_v6 = vpop.xlane.xlu1 %271 }
  0xae   : > { %v559_v50 = vrot.slane %v549_v41, %v1638_v32  ;;  %v566_v51 = vrot.slane %v550_v42, %v1638_v32  ;;  %v328_v52 = vrot.slane %v266_v45, %v1614_v22  ;;  %v332_v53 = vrot.slane %v266_v45, %v1617_v23 }
  0xaf   : > { %v573_v54 = vrot.slane %v551_v46, %v1638_v32  ;;  %v580_v55 = vrot.slane %v552_v47, %v1638_v32  ;;  %v336_v56 = vrot.slane %v266_v45, %v1620_v24  ;;  %v340_v57 = vrot.slane %v266_v45, %v1623_v25 }
  0xb0   : > { %v581_v58 = vcombine.low %v559_v50, %v566_v51  ;;  %v344_v59 = vrot.slane %v266_v45, %v1626_v26  ;;  %v348_v60 = vrot.slane %v266_v45, %v1629_v27  ;;  %v352_v61 = vrot.slane %v266_v45, %v1632_v28 }
  0xb1   : > { %v582_v62 = vcombine.low %v573_v54, %v580_v55  ;;  %v356_v63 = vrot.slane %v266_v45, %v1635_v29  ;;  %v598_v0 = vcombine.low %v328_v52, %v332_v53  ;;  %v599_v1 = vcombine.low %v336_v56, %v340_v57  ;;  %v275_v42 = vpop.xlane.xlu0 %274 }
  0xb2   : > { %v589_v2 = vrot.slane %v581_v58, %v1638_v32  ;;  %v600_v3 = vcombine.low %v344_v59, %v348_v60  ;;  %v376_v4 = vrot.slane %v269_v31, %v1626_v26  ;;  %v380_v5 = vrot.slane %v269_v31, %v1629_v27  ;;  %v278_v59 = vpop.xlane.xlu1 %277 }
  0xb3   : > { %v596_v7 = vrot.slane %v582_v62, %v1638_v32  ;;  %v601_v8 = vcombine.low %v352_v61, %v356_v63  ;;  %v608_v9 = vrot.slane %v598_v0, %v1638_v32  ;;  %v615_v10 = vrot.slane %v599_v1, %v1638_v32 }
  0xb4   : > { %v622_v11 = vrot.slane %v600_v3, %v1638_v32  ;;  %v384_v12 = vrot.slane %v269_v31, %v1632_v28  ;;  %v388_v13 = vrot.slane %v269_v31, %v1635_v29  ;;  %v647_v14 = vcombine.low %v360_v43, %v364_v44 }
  0xb5   : > { %v597_v15 = vcombine.low %v589_v2, %v596_v7  ;;  %v629_v16 = vrot.slane %v601_v8, %v1638_v32  ;;  %v630_v18 = vcombine.low %v608_v9, %v615_v10  ;;  %v648_v19 = vcombine.low %v368_v48, %v372_v49 }
  0xb6   : > { %v649_v21 = vcombine.low %v376_v4, %v380_v5  ;;  %v650_v30 = vcombine.low %v384_v12, %v388_v13  ;;  %v657_v33 = vrot.slane %v647_v14, %v1638_v32  ;;  %v392_v34 = vrot.slane %v272_v6, %v1614_v22 }
  0xb7   : > { %942 = vperm.xlu0 %1424, %v597_v15   ;;  %v631_v35 = vcombine.low %v622_v11, %v629_v16  ;;  %v638_v36 = vrot.slane %v630_v18, %v1638_v32  ;;  %v664_v37 = vrot.slane %v648_v19, %v1638_v32  ;;  %v396_v31 = vrot.slane %v272_v6, %v1617_v23 }
  0xb8   : > { %v671_v38 = vrot.slane %v649_v21, %v1638_v32  ;;  %v678_v39 = vrot.slane %v650_v30, %v1638_v32  ;;  %v400_v40 = vrot.slane %v272_v6, %v1620_v24  ;;  %v404_v41 = vrot.slane %v272_v6, %v1623_v25  ;;  %v281_v30 = vpop.xlane.xlu0 %280 }
  0xb9   : > { %v645_v43 = vrot.slane %v631_v35, %v1638_v32  ;;  %v679_v44 = vcombine.low %v657_v33, %v664_v37  ;;  %v408_v45 = vrot.slane %v272_v6, %v1626_v26  ;;  %v412_v46 = vrot.slane %v272_v6, %v1629_v27 }
  0xba   : > { %v680_v47 = vcombine.low %v671_v38, %v678_v39  ;;  %v416_v48 = vrot.slane %v272_v6, %v1632_v28  ;;  %v420_v49 = vrot.slane %v272_v6, %v1635_v29  ;;  %v696_v50 = vcombine.low %v392_v34, %v396_v31 }
  0xbb   : > { %v646_v51 = vcombine.low %v638_v36, %v645_v43  ;;  %v687_v52 = vrot.slane %v679_v44, %v1638_v32  ;;  %v697_v53 = vcombine.low %v400_v40, %v404_v41  ;;  %v698_v54 = vcombine.low %v408_v45, %v412_v46 }
  0xbc   : > { %v694_v55 = vrot.slane %v680_v47, %v1638_v32  ;;  %v699_v56 = vcombine.low %v416_v48, %v420_v49  ;;  %v706_v57 = vrot.slane %v696_v50, %v1638_v32  ;;  %v424_v58 = vrot.slane %v275_v42, %v1614_v22 }
  0xbd   : > { %945 = vperm.xlu1 %1425, %v646_v51   ;;  %v713_v60 = vrot.slane %v697_v53, %v1638_v32  ;;  %v720_v61 = vrot.slane %v698_v54, %v1638_v32  ;;  %v428_v62 = vrot.slane %v275_v42, %v1617_v23  ;;  %v432_v63 = vrot.slane %v275_v42, %v1620_v24 }
  0xbe   : > { %v695_v0 = vcombine.low %v687_v52, %v694_v55  ;;  %v727_v1 = vrot.slane %v699_v56, %v1638_v32  ;;  %v436_v2 = vrot.slane %v275_v42, %v1623_v25  ;;  %v440_v3 = vrot.slane %v275_v42, %v1626_v26  ;;  %v284_v52 = vpop.xlane.xlu1 %283 }
  0xbf   : > { %v728_v4 = vcombine.low %v706_v57, %v713_v60  ;;  %v444_v5 = vrot.slane %v275_v42, %v1629_v27  ;;  %v448_v6 = vrot.slane %v275_v42, %v1632_v28  ;;  %v452_v7 = vrot.slane %v275_v42, %v1635_v29 }
  0xc0   : > { %v729_v8 = vcombine.low %v720_v61, %v727_v1  ;;  %v745_v9 = vcombine.low %v424_v58, %v428_v62  ;;  %v746_v10 = vcombine.low %v432_v63, %v436_v2  ;;  %v456_v11 = vrot.slane %v278_v59, %v1614_v22 }
  0xc1   : > { %948 = vperm.xlu1 %1425, %v695_v0   ;;  %v736_v12 = vrot.slane %v728_v4, %v1638_v32  ;;  %v747_v13 = vcombine.low %v440_v3, %v444_v5  ;;  %v748_v14 = vcombine.low %v448_v6, %v452_v7  ;;  %v460_v15 = vrot.slane %v278_v59, %v1617_v23 }
  0xc2   : > { %v743_v16 = vrot.slane %v729_v8, %v1638_v32  ;;  %v755_v18 = vrot.slane %v745_v9, %v1638_v32  ;;  %v762_v19 = vrot.slane %v746_v10, %v1638_v32  ;;  %v464_v21 = vrot.slane %v278_v59, %v1620_v24 }
  0xc3   : > { %v769_v33 = vrot.slane %v747_v13, %v1638_v32  ;;  %v776_v34 = vrot.slane %v748_v14, %v1638_v32  ;;  %v468_v35 = vrot.slane %v278_v59, %v1623_v25  ;;  %v472_v36 = vrot.slane %v278_v59, %v1626_v26 }
  0xc4   : > { %v744_v37 = vcombine.low %v736_v12, %v743_v16  ;;  %v777_v31 = vcombine.low %v755_v18, %v762_v19  ;;  %v476_v38 = vrot.slane %v278_v59, %v1629_v27  ;;  %v480_v39 = vrot.slane %v278_v59, %v1632_v28 }
  0xc5   : > { %v778_v40 = vcombine.low %v769_v33, %v776_v34  ;;  %v484_v41 = vrot.slane %v278_v59, %v1635_v29  ;;  %v794_v42 = vcombine.low %v456_v11, %v460_v15  ;;  %v795_v43 = vcombine.low %v464_v21, %v468_v35 }
  0xc6   : > { %951 = vperm.xlu1 %1425, %v744_v37   ;;  %v785_v44 = vrot.slane %v777_v31, %v1638_v32  ;;  %v796_v45 = vcombine.low %v472_v36, %v476_v38  ;;  %v488_v46 = vrot.slane %v281_v30, %v1614_v22  ;;  %v492_v47 = vrot.slane %v281_v30, %v1617_v23 }
  0xc7   : > { %v792_v48 = vrot.slane %v778_v40, %v1638_v32  ;;  %v797_v49 = vcombine.low %v480_v39, %v484_v41  ;;  %v804_v50 = vrot.slane %v794_v42, %v1638_v32  ;;  %v811_v51 = vrot.slane %v795_v43, %v1638_v32  ;;  %v1043_v41 = vld [vmem:[%s1861_s1] sm:$0xff]  ;;  %v1044_v42 = vld [vmem:[%s1861_s1 + $0x8] sm:$0xff] }
  0xc8   : > { %v818_v53 = vrot.slane %v796_v45, %v1638_v32  ;;  %v496_v54 = vrot.slane %v281_v30, %v1620_v24  ;;  %v500_v55 = vrot.slane %v281_v30, %v1623_v25  ;;  %v504_v56 = vrot.slane %v281_v30, %v1626_v26  ;;  %v1045_v45 = vld [vmem:[%s1861_s1 + $0x10] sm:$0xff] }
  0xc9   : > { %v793_v57 = vcombine.low %v785_v44, %v792_v48  ;;  %v825_v58 = vrot.slane %v797_v49, %v1638_v32  ;;  %v826_v59 = vcombine.low %v804_v50, %v811_v51  ;;  %v508_v60 = vrot.slane %v281_v30, %v1629_v27  ;;  %v1048_v49 = vld [vmem:[%s1861_s1 + $0x28] sm:$0xff]  ;;  %v1049_v51 = vld [vmem:[%s1861_s1 + $0x30] sm:$0xff] }
  0xca   : > { %v512_v61 = vrot.slane %v281_v30, %v1632_v28  ;;  %v516_v62 = vrot.slane %v281_v30, %v1635_v29  ;;  %v843_v63 = vcombine.low %v488_v46, %v492_v47  ;;  %v844_v0 = vcombine.low %v496_v54, %v500_v55  ;;  %v1046_v46 = vld [vmem:[%s1861_s1 + $0x18] sm:$0xff]  ;;  %v1047_v47 = vld [vmem:[%s1861_s1 + $0x20] sm:$0xff]  ;;  %v1127_v55 = vld [vmem:[%s1863_s3 + $0x8] sm:$0xff] }
  0xcb   : > { %954 = vperm.xlu1 %1425, %v793_v57   ;;  %v827_v1 = vcombine.low %v818_v53, %v825_v58  ;;  %v834_v2 = vrot.slane %v826_v59, %v1638_v32  ;;  %v845_v3 = vcombine.low %v504_v56, %v508_v60  ;;  %v520_v4 = vrot.slane %v284_v52, %v1614_v22  ;;  %v1126_v54 = vld [vmem:[%s1863_s3] sm:$0xff] }
  0xcc   : > { %v846_v5 = vcombine.low %v512_v61, %v516_v62  ;;  %v853_v6 = vrot.slane %v843_v63, %v1638_v32  ;;  %v860_v7 = vrot.slane %v844_v0, %v1638_v32  ;;  %v524_v8 = vrot.slane %v284_v52, %v1617_v23 }
  0xcd   : > { %v841_v9 = vrot.slane %v827_v1, %v1638_v32  ;;  %v867_v10 = vrot.slane %v845_v3, %v1638_v32  ;;  %v528_v11 = vrot.slane %v284_v52, %v1620_v24  ;;  %v532_v12 = vrot.slane %v284_v52, %v1623_v25 }
  0xce   : > { %v874_v13 = vrot.slane %v846_v5, %v1638_v32  ;;  %v875_v14 = vcombine.low %v853_v6, %v860_v7  ;;  %v536_v22 = vrot.slane %v284_v52, %v1626_v26  ;;  %v540_v15 = vrot.slane %v284_v52, %v1629_v27 }
  0xcf   : > { %v842_v16 = vcombine.low %v834_v2, %v841_v9  ;;  %v544_v18 = vrot.slane %v284_v52, %v1632_v28  ;;  %v548_v23 = vrot.slane %v284_v52, %v1635_v29  ;;  %v892_v19 = vcombine.low %v520_v4, %v524_v8  ;;  %v1050_v52 = vld [vmem:[%s1861_s1 + $0x38] sm:$0xff] }
  0xd0   : > { %v876_v21 = vcombine.low %v867_v10, %v874_v13  ;;  %v883_v30 = vrot.slane %v875_v14, %v1638_v32  ;;  %v893_v33 = vcombine.low %v528_v11, %v532_v12  ;;  %v894_v24 = vcombine.low %v536_v22, %v540_v15 }
  0xd1   : > { %957 = vperm.xlu1 %1425, %v842_v16   ;;  %v895_v25 = vcombine.low %v544_v18, %v548_v23  ;;  %v902_v34 = vrot.slane %v892_v19, %v1638_v32  ;;  %v1508_v40 = vmov 0.0   ;;  %v1347_v43 = vpack.c.bf16 %v1044_v42, %v1043_v41 }
  0xd2   : > { %v890_v35 = vrot.slane %v876_v21, %v1638_v32  ;;  %v909_v26 = vrot.slane %v893_v33, %v1638_v32  ;;  %v916_v27 = vrot.slane %v894_v24, %v1638_v32  ;;  %250 = vst.msk [vmem:[#allocation2] sm:$0x1] %vm249_vm1, %v1508_v40  ;;  %v1509_v44 = vmov 0.0|0.0   ;;  %1332 = vmatprep.mubr.msk.f32.mxu0 %vm1510_vm2, %v1508_v40 }
  0xd3   : > { %v923_v28 = vrot.slane %v895_v25, %v1638_v32  ;;  %1346 = vmatprep.subr.bf16.mxu0 %v1509_v44  ;;  %1358 = vmatprep.subr.bf16.mxu1 %v1509_v44  ;;  %v1350_v48 = vpack.c.bf16 %v1046_v46, %v1045_v45  ;;  %v1353_v50 = vpack.c.bf16 %v1048_v49, %v1047_v47  ;;  %v966_v60 = vand.u32 127, %v293_v17  ;;  %v1130_v46 = vld [vmem:[%s1864_s4] sm:$0x1] }
  0xd4   : > { %v891_v36 = vcombine.low %v883_v30, %v890_v35  ;;  %v924_v29 = vcombine.low %v902_v34, %v909_v26  ;;  %1348 = vmatpush3.bf16.msra.mxu0 %v1347_v43  ;;  %1343 = vmatprep.mubr.msk.f32.mxu1 %vm1510_vm2, %v1508_v40  ;;  %v1356_v53 = vpack.c.bf16 %v1050_v52, %v1049_v51  ;;  %v1129_v40 = vld [vmem:[%s1863_s3 + $0x18] sm:$0xff] }
  0xd5   : > { %v925_v37 = vcombine.low %v916_v27, %v923_v28  ;;  %1349 = vmatprep.subr.bf16.mxu0 %v1509_v44  ;;  %v1359_v56 = vpack.c.bf16 %v1127_v55, %v1126_v54  ;;  %v971_v62 = vadd.s32 4294967288, %v966_v60  ;;  %v978_v63 = vadd.s32 4294967280, %v966_v60 }
  0xd6   : > { %960 = vperm.xlu1 %1425, %v891_v36   ;;  %v932_v31 = vrot.slane %v924_v29, %v1638_v32  ;;  %v985_v0 = vadd.s32 4294967272, %v966_v60  ;;  %v992_v1 = vadd.s32 4294967264, %v966_v60  ;;  %v999_v3 = vadd.s32 4294967256, %v966_v60 }
  0xd7   : > { %v939_v38 = vrot.slane %v925_v37, %v1638_v32  ;;  %1360 = vmatpush3.bf16.msra.mxu1 %v1359_v56  ;;  %v974_v2 = vsub.s32 %v971_v62, %v1611_v20  ;;  %v981_v4 = vsub.s32 %v978_v63, %v1611_v20  ;;  %v1006_v6 = vadd.s32 4294967248, %v966_v60 }
  0xd8   : > { %1351 = vmatpush3.bf16.msra.mxu0 %v1350_v48  ;;  %1361 = vmatprep.subr.bf16.mxu1 %v1509_v44  ;;  %v969_v7 = vsub.s32 %v966_v60, %v1611_v20  ;;  %v988_v8 = vsub.s32 %v985_v0, %v1611_v20  ;;  %v995_v10 = vsub.s32 %v992_v1, %v1611_v20  ;;  %v1013_v12 = vadd.s32 4294967240, %v966_v60 }
  0xd9   : > { %v940_v39 = vcombine.low %v932_v31, %v939_v38  ;;  %1352 = vmatprep.subr.bf16.mxu0 %v1509_v44  ;;  %v1002_v11 = vsub.s32 %v999_v3, %v1611_v20  ;;  %v1009_v14 = vsub.s32 %v1006_v6, %v1611_v20  ;;  %v259_v29 = vld [vmem:[#allocation2] sm:$0x1] }
  0xda   : > { %v1016_v21 = vsub.s32 %v1013_v12, %v1611_v20 }
  0xdb   : > { %963 = vperm.xlu1 %1425, %v940_v39   ;;  %v1128_v39 = vld [vmem:[%s1863_s3 + $0x10] sm:$0xff] }
  0xdc   : > { %1354 = vmatpush3.bf16.msra.mxu0 %v1353_v50  ;;  %v1362_v41 = vpack.c.bf16 %v1129_v40, %v1128_v39 }
  0xdd   : > { %1355 = vmatprep.subr.bf16.mxu0 %v1509_v44 }
  0xde   : > { %1363 = vmatpush3.bf16.msra.mxu1 %v1362_v41 }
  0xe0   : > { %1357 = vmatpush3.bf16.msra.mxu0 %v1356_v53 }
 0x136   : > { %v943_v9 = vpop.permute.xlu0 %942 }
 0x137   : > { %v970_v22 = vrot.slane %v943_v9, %v969_v7 }
 0x13c   : > { %v946_v57 = vpop.permute.xlu1 %945 }
 0x13d   : > { %v975_v17 = vrot.slane %v946_v57, %v974_v2 }
 0x13f   : > { %v977_v23 = vsel %vm976_vm3, %v975_v17, %v970_v22 }
 0x140   : > { %v949_v58 = vpop.permute.xlu1 %948 }
 0x141   : > { %v982_v13 = vrot.slane %v949_v58, %v981_v4 }
 0x143   : > { %v984_v30 = vsel %vm983_vm4, %v982_v13, %v977_v23 }
 0x145   : > { %v952_v59 = vpop.permute.xlu1 %951 }
 0x146   : > { %v989_v15 = vrot.slane %v952_v59, %v988_v8 }
 0x148   : > { %v991_v24 = vsel %vm990_vm5, %v989_v15, %v984_v30 }
 0x14a   : > { %v955_v61 = vpop.permute.xlu1 %954 }
 0x14b   : > { %v996_v18 = vrot.slane %v955_v61, %v995_v10 }
 0x14d   : > { %v998_v25 = vsel %vm997_vm6, %v996_v18, %v991_v24 }
 0x150   : > { %v958_v5 = vpop.permute.xlu1 %957 }
 0x151   : > { %v1003_v19 = vrot.slane %v958_v5, %v1002_v11 }
 0x153   : > { %v1005_v35 = vsel %vm1004_vm7, %v1003_v19, %v998_v25 }
 0x155   : > { %v961_v16 = vpop.permute.xlu1 %960 }
 0x156   : > { %v1010_v33 = vrot.slane %v961_v16, %v1009_v14 }
 0x158   : > { %v1012_v27 = vsel %vm1011_vm8, %v1010_v33, %v1005_v35 }
 0x15a   : > { %v964_v34 = vpop.permute.xlu1 %963 }
 0x15b   : > { %v1017_v26 = vrot.slane %v964_v34, %v1016_v21 }
 0x15d   : > { %v1019_v28 = vsel %vm1018_vm9, %v1017_v26, %v1012_v27 }
 0x15e   : > { %v1026_v36 = vrot.slane %v1019_v28, %v1638_v32 }
 0x160   : > { %v1033_v37 = vrot.slane %v1026_v36, %v1638_v32  ;;  %v1051_v32 = vld [vmem:[%s1862_s2] sm:$0x1] }
 0x162   : > { %v1035_v31 = vadd.f32 %v1033_v37, %v259_v29 }
 0x164   : > { %1037 = vst.msk [vmem:[#allocation2] sm:$0x1] %vm249_vm1, %v1035_v31 }
 0x16b   : > { %v1041_v20 = vld [vmem:[#allocation2] sm:$0x1] }
 0x16c   : > { %v1042_v38 = vmul.f32 0.015625, %v1041_v20 }
 0x16e   : > { %1333 = vmatmul.mubr.msk.f32.vlgmr.msra.gmra.mrb[0].mxu0 %vm260_vm0, %v1042_v38 }
 0x241   : > { %v1121_v42 = vpop.f32.mrb[0].mxu0 }
 0x242   : > { %v1122_v43 = vadd.f32 %v1121_v42, %v1051_v32  ;;  %v1334_v44 = vpop.f32.mrb[1].mxu0 }
 0x244   : > { %v1125_v45 = vmax.f32 %v1122_v43, 0.0 }
 0x246   : > { %1344 = vmatmul.mubr.msk.f32.vlgmr.msra.gmra.mrb[0].mxu1 %vm1131_vm10, %v1125_v45 }
 0x319   : > { %v1201_v47 = vpop.f32.mrb[0].mxu1 }
 0x31a   : > { %v1202_v48 = vadd.f32 %v1201_v47, %v1130_v46  ;;  %v1345_v49 = vpop.f32.mrb[1].mxu1 }
 0x31c   : > { %1206 = vst.msk [vmem:[%s236_s12] sm:$0x1] %vm1205_vm11, %v1202_v48 }
 0x31d   : > { %1439 = shalt.err (!%p1436_p5)
}
 0x31e   : > { %s1440_s29 = scalar_lea.hbm %s1813_s16, 16  ;;  %s1444_s9 = scalar_lea.hbm %s1865_s5, 32 }
 0x31f   : > { %p1441_p6 = scmp.ne.s32.totalorder %s1813_s16, %s1440_s29  ;;  %p1445_p10 = scmp.lt.u32.totalorder %s1813_s16, %s1865_s5 }
 0x320   : > { %p1446_p11 = scmp.lt.u32.totalorder %s1444_s9, %s1440_s29  ;;  %p1448_p13 = scmp.lt.u32.totalorder %s1440_s29, %s1813_s16 }
 0x321   : > { %p1442_p7 = pnand %p1441_p6, %p1582_p4 }
 0x322   : > { %p1447_p12 = por %p1446_p11, %p1445_p10 }
 0x323   : > { %p1443_p9 = pneg %p1442_p7 }
 0x324   : > { %p1449_p0 = por %p1448_p13, %p1447_p12 }
 0x326   : > { %p1450_p1 = pnand %p1449_p0, %p1443_p9 }
 0x328   : > { %1453 = shalt.err (!%p1450_p1)
}
 0x329   : > { %1364 = dma.vmem_to_hbm [thread:$0]  (%p1582_p4), %s1815_s13, 16, %s1813_s16, %s1208_s17  }
 0x32a PF: > { %p1370_p2 = scmp.ge.s32.totalorder %s1504_s23, 2  ;;  %s1232_s12 = sand.u32 1, %s1484_s18  }
 0x32b   : > { %s1233_s14 = scalar_lea.sflag [#allocation4], %s1232_s12 }
 0x32c   : > { %p1367_p3 = pnand %p1370_p2, %p1589_p8 }
 0x32e   : > { %1479 = dma.done.wait (!%p1367_p3), %s1233_s14, 16  }
 0x32f   : > { %1481 = vsyncadd (!%p1367_p3), %s1233_s14, 4294967280  ;;  %s18_s23 = sadd.s32 1, %s1504_s23   ;;  %s1868_s18 = smov %s1488_s19 }
 0x330   : > { %p15_p5 = scmp.ge.s32.totalorder %s18_s23, 4   ;;  %s1869_s19 = smov %s1492_s20 }
 0x331   : > { %s1870_s20 = smov %s1595_s6  ;;  %s1871_s21 = smov %s1500_s22 }
 0x332   : > { %s1872_s22 = smov %s1874_s26  ;;  %17 = sbr.rel (!%p15_p5) target bundleno = 4 (0x4), region = 83 }
 0x339   :  { %1237 = vsyncpa [#allocation4], 1 }
 0x33a   :  { %1239 = vsyncpa [#allocation4 + $0x1], 1 }

</bundles_post_ra>
